<compile_context>
chip_gen: v6e
topology: v6e:2x2x1
jax: 0.10.0
libtpu: 0.0.40
codegen_flags: <defaults>
</compile_context>

<pallas_src>
import functools
import math

import jax
import jax.numpy as jnp
from jax.experimental import pallas as pl
from jax.experimental.pallas import tpu as pltpu


def _gelu_tanh(x):
    # TODO(synk): PyTorch nn.GELU() defaults to the exact erf formulation; the
    # tanh approximation (used here and in the reference) differs by ~1e-3.
    c = math.sqrt(2.0 / math.pi)
    return 0.5 * x * (1.0 + jnp.tanh(c * (x + 0.044715 * x * x * x)))


def _layernorm(x, gamma, beta, eps):
    mean = jnp.mean(x, axis=-1, keepdims=True)
    var = jnp.mean((x - mean) ** 2, axis=-1, keepdims=True)
    return (x - mean) * jax.lax.rsqrt(var + eps) * gamma + beta


# ----------------------------------------------------------------------------
# Single fused kernel: all layers + final LayerNorm.
# grid = (B, depth); activations carried across the layer axis in VMEM scratch.
# ----------------------------------------------------------------------------
def _transformer_kernel(x_ref,
                        a_g_ref, a_b_ref, wqkv_ref, wout_ref, bout_ref,
                        f_g_ref, f_b_ref, w1_ref, b1_ref, w2_ref, b2_ref,
                        fin_g_ref, fin_b_ref,
                        o_ref, x_sc,
                        *, heads, dim_head, scale, eps):
    l = pl.program_id(1)

    # Layer 0: bring this batch row's activations into the VMEM carry.
    @pl.when(l == 0)
    def _():
        x_sc[...] = x_ref[0]

    x = x_sc[...]                                            # (N, D) f32 carry
    inner = heads * dim_head

    # ---- Attention block: LN -> QKV -> MHSA -> out-proj -> residual --------
    xn = _layernorm(x, a_g_ref[0], a_b_ref[0], eps)
    qkv = jnp.dot(xn.astype(jnp.bfloat16), wqkv_ref[0],
                  preferred_element_type=jnp.float32)        # (N, 3*inner) f32
    w_out = wout_ref[0]                                      # (inner, D) bf16
    acc = jnp.zeros(x.shape, jnp.float32)                    # (N, D) f32

    for h in range(heads):                                   # static unrolled
        q = qkv[:, h * dim_head:(h + 1) * dim_head] * scale            # fold scale
        k = qkv[:, inner + h * dim_head: inner + (h + 1) * dim_head]
        v = qkv[:, 2 * inner + h * dim_head: 2 * inner + (h + 1) * dim_head]

        # q @ k^T without materializing a transposed copy of k.
        s = jax.lax.dot_general(q.astype(jnp.bfloat16), k.astype(jnp.bfloat16),
                                (((1,), (1,)), ((), ())),
                                preferred_element_type=jnp.float32)     # (N, N)
        s = s - jnp.max(s, axis=-1, keepdims=True)           # stable softmax
        p = jnp.exp(s)
        p = p * pl.reciprocal(jnp.sum(p, axis=-1, keepdims=True), approx=True)

        o_h = jnp.dot(p.astype(jnp.bfloat16), v.astype(jnp.bfloat16),
                      preferred_element_type=jnp.float32)    # (N, dh)

        # Fold this head directly into the output projection.
        acc = acc + jnp.dot(o_h.astype(jnp.bfloat16),
                            w_out[h * dim_head:(h + 1) * dim_head, :],
                            preferred_element_type=jnp.float32)

    x = acc + bout_ref[0] + x                                # bias + residual

    # ---- FeedForward block: LN -> Linear -> GELU -> Linear -> residual -----
    xn = _layernorm(x, f_g_ref[0], f_b_ref[0], eps)
    h1 = jnp.dot(xn.astype(jnp.bfloat16), w1_ref[0],
                 preferred_element_type=jnp.float32) + b1_ref[0]
    h1 = _gelu_tanh(h1)
    y = jnp.dot(h1.astype(jnp.bfloat16), w2_ref[0],
                preferred_element_type=jnp.float32) + b2_ref[0]
    x = y + x

    x_sc[...] = x                                            # carry to next layer

    # Final LayerNorm fused into the last layer step: single lane-dense store.
    @pl.when(l == pl.num_programs(1) - 1)
    def _():
        o_ref[0] = _layernorm(x, fin_g_ref[...], fin_b_ref[...], eps)


def transformer_forward(x, params, *, heads, dim_head, eps=1e-5):
    B, N, D = x.shape
    layers = params["layers"]
    depth = len(layers)
    inner = heads * dim_head
    H = layers[0]["ff"]["w1"].shape[1]
    scale = dim_head ** -0.5

    # Stack per-layer parameters along a leading depth axis (cheap; could be
    # hoisted out of jit / done at parameter-build time for repeated calls).
    a_g = jnp.stack([L["attn"]["ln_gamma"] for L in layers])             # (depth,1,D)
    a_b = jnp.stack([L["attn"]["ln_beta"] for L in layers])
    wqkv = jnp.stack([L["attn"]["w_qkv"] for L in layers]).astype(jnp.bfloat16)
    wout = jnp.stack([L["attn"]["w_out"] for L in layers]).astype(jnp.bfloat16)
    bout = jnp.stack([L["attn"]["b_out"] for L in layers])
    f_g = jnp.stack([L["ff"]["ln_gamma"] for L in layers])
    f_b = jnp.stack([L["ff"]["ln_beta"] for L in layers])
    w1 = jnp.stack([L["ff"]["w1"] for L in layers]).astype(jnp.bfloat16)
    b1 = jnp.stack([L["ff"]["b1"] for L in layers])
    w2 = jnp.stack([L["ff"]["w2"] for L in layers]).astype(jnp.bfloat16)
    b2 = jnp.stack([L["ff"]["b2"] for L in layers])

    xmap = lambda b, l: (b, 0, 0)    # activations: indexed by batch only
    lmap = lambda b, l: (l, 0, 0)    # weights: indexed by layer only
    cmap = lambda b, l: (0, 0)       # final-LN params: constant

    return pl.pallas_call(
        functools.partial(_transformer_kernel, heads=heads, dim_head=dim_head,
                          scale=scale, eps=eps),
        out_shape=jax.ShapeDtypeStruct((B, N, D), jnp.float32),
        grid=(B, depth),
        in_specs=[
            pl.BlockSpec((1, N, D), xmap),                   # x
            pl.BlockSpec((1, 1, D), lmap),                   # attn ln gamma
            pl.BlockSpec((1, 1, D), lmap),                   # attn ln beta
            pl.BlockSpec((1, D, 3 * inner), lmap),           # w_qkv
            pl.BlockSpec((1, inner, D), lmap),               # w_out
            pl.BlockSpec((1, 1, D), lmap),                   # b_out
            pl.BlockSpec((1, 1, D), lmap),                   # ff ln gamma
            pl.BlockSpec((1, 1, D), lmap),                   # ff ln beta
            pl.BlockSpec((1, D, H), lmap),                   # w1
            pl.BlockSpec((1, 1, H), lmap),                   # b1
            pl.BlockSpec((1, H, D), lmap),                   # w2
            pl.BlockSpec((1, 1, D), lmap),                   # b2
            pl.BlockSpec((1, D), cmap),                      # final ln gamma
            pl.BlockSpec((1, D), cmap),                      # final ln beta
        ],
        out_specs=pl.BlockSpec((1, N, D), xmap),
        scratch_shapes=[pltpu.VMEM((N, D), jnp.float32)],    # activation carry
        compiler_params=pltpu.CompilerParams(
            dimension_semantics=("parallel", "arbitrary")),
    )(x, a_g, a_b, wqkv, wout, bout, f_g, f_b, w1, b1, w2, b2,
      params["final_ln_gamma"], params["final_ln_beta"])


# ----------------------------------------------------------------------------
# Pure-JAX f32 reference (mirrors the PyTorch module; dropout = identity)
# ----------------------------------------------------------------------------
def transformer_ref(x, params, *, heads, dim_head):
    def ln(t, g, b, eps=1e-5):
        m = jnp.mean(t, -1, keepdims=True)
        v = jnp.mean((t - m) ** 2, -1, keepdims=True)
        return (t - m) / jnp.sqrt(v + eps) * g + b

    B, N, D = x.shape
    inner = heads * dim_head
    scale = dim_head ** -0.5
    for layer in params["layers"]:
        a = layer["attn"]
        xn = ln(x, a["ln_gamma"], a["ln_beta"])
        qkv = xn @ a["w_qkv"]
        q, k, v = jnp.split(qkv, 3, axis=-1)
        rh = lambda t: t.reshape(B, N, heads, dim_head).transpose(0, 2, 1, 3)
        q, k, v = rh(q), rh(k), rh(v)
        s = jnp.einsum("bhnd,bhmd->bhnm", q, k) * scale
        p = jax.nn.softmax(s, axis=-1)
        o = jnp.einsum("bhnm,bhmd->bhnd", p, v)
        o = o.transpose(0, 2, 1, 3).reshape(B, N, inner)
        x = o @ a["w_out"] + a["b_out"] + x

        f = layer["ff"]
        h = ln(x, f["ln_gamma"], f["ln_beta"]) @ f["w1"] + f["b1"]
        h = _gelu_tanh(h)
        x = h @ f["w2"] + f["b2"] + x
    return ln(x, params["final_ln_gamma"], params["final_ln_beta"])


if __name__ == "__main__":
    # Small, module-consistent shapes: Transformer(dim, depth, heads, dim_head, mlp_dim)
    B, N = 2, 8
    dim, depth, heads, dim_head, mlp_dim = 32, 2, 4, 16, 64
    inner = heads * dim_head

    key = jax.random.PRNGKey(0)
    key, kx = jax.random.split(key)
    x = jax.random.normal(kx, (B, N, dim), dtype=jnp.float32)

    layers = []
    for _ in range(depth):
        key, k1, k2, k3, k4, k5, k6 = jax.random.split(key, 7)
        layers.append({
            "attn": {
                "ln_gamma": jnp.ones((1, dim), jnp.float32),
                "ln_beta": jnp.zeros((1, dim), jnp.float32),
                "w_qkv": jax.random.normal(k1, (dim, 3 * inner), jnp.float32) * dim ** -0.5,
                "w_out": jax.random.normal(k2, (inner, dim), jnp.float32) * inner ** -0.5,
                "b_out": jax.random.normal(k3, (1, dim), jnp.float32) * 0.01,
            },
            "ff": {
                "ln_gamma": jnp.ones((1, dim), jnp.float32),
                "ln_beta": jnp.zeros((1, dim), jnp.float32),
                "w1": jax.random.normal(k4, (dim, mlp_dim), jnp.float32) * dim ** -0.5,
                "b1": jax.random.normal(k5, (1, mlp_dim), jnp.float32) * 0.01,
                "w2": jax.random.normal(k6, (mlp_dim, dim), jnp.float32) * mlp_dim ** -0.5,
                "b2": jnp.zeros((1, dim), jnp.float32),
            },
        })
    params = {
        "layers": layers,
        "final_ln_gamma": jnp.ones((1, dim), jnp.float32),
        "final_ln_beta": jnp.zeros((1, dim), jnp.float32),
    }

    fwd = jax.jit(functools.partial(transformer_forward, heads=heads, dim_head=dim_head))
    out = jax.block_until_ready(fwd(x, params))

    ref = transformer_ref(x, params, heads=heads, dim_head=dim_head)
    assert out.shape == (B, N, dim)
    # Matmuls run with bf16 operands (f32 accumulation), so compare against the
    # f32 reference at bf16-appropriate tolerance; structural bugs would be O(1).
    assert jnp.allclose(out, ref, atol=5e-2, rtol=5e-2), "mismatch vs reference"

    print("KERNEL_OK")
</pallas_src>

<mosaic_0001>
module attributes {stable_mosaic.version = 11 : i64} {
  func.func @_transformer_kernel(%arg0: i32, %arg1: i32, %arg2: memref<1x8x32xf32, #tpu.memory_space<vmem>>, %arg3: memref<1x1x32xf32, #tpu.memory_space<vmem>>, %arg4: memref<1x1x32xf32, #tpu.memory_space<vmem>>, %arg5: memref<1x32x192xbf16, #tpu.memory_space<vmem>>, %arg6: memref<1x64x32xbf16, #tpu.memory_space<vmem>>, %arg7: memref<1x1x32xf32, #tpu.memory_space<vmem>>, %arg8: memref<1x1x32xf32, #tpu.memory_space<vmem>>, %arg9: memref<1x1x32xf32, #tpu.memory_space<vmem>>, %arg10: memref<1x32x64xbf16, #tpu.memory_space<vmem>>, %arg11: memref<1x1x64xf32, #tpu.memory_space<vmem>>, %arg12: memref<1x64x32xbf16, #tpu.memory_space<vmem>>, %arg13: memref<1x1x32xf32, #tpu.memory_space<vmem>>, %arg14: memref<1x32xf32, #tpu.memory_space<vmem>>, %arg15: memref<1x32xf32, #tpu.memory_space<vmem>>, %arg16: memref<1x8x32xf32, #tpu.memory_space<vmem>>, %arg17: memref<8x32xf32, #tpu.memory_space<vmem>>) attributes {dimension_semantics = [#tpu.dimension_semantics<parallel>, #tpu.dimension_semantics<arbitrary>], iteration_bounds = array<i64: 2, 2>, scalar_prefetch = 0 : i64, scratch_operands = 1 : i64, tpu.core_type = #tpu.core_type<tc>, window_params = [{transform_indices = @transform_0, window_bounds = array<i64: 1, 8, 32>}, {transform_indices = @transform_1, window_bounds = array<i64: 1, 1, 32>}, {transform_indices = @transform_2, window_bounds = array<i64: 1, 1, 32>}, {transform_indices = @transform_3, window_bounds = array<i64: 1, 32, 192>}, {transform_indices = @transform_4, window_bounds = array<i64: 1, 64, 32>}, {transform_indices = @transform_5, window_bounds = array<i64: 1, 1, 32>}, {transform_indices = @transform_6, window_bounds = array<i64: 1, 1, 32>}, {transform_indices = @transform_7, window_bounds = array<i64: 1, 1, 32>}, {transform_indices = @transform_8, window_bounds = array<i64: 1, 32, 64>}, {transform_indices = @transform_9, window_bounds = array<i64: 1, 1, 64>}, {transform_indices = @transform_10, window_bounds = array<i64: 1, 64, 32>}, {transform_indices = @transform_11, window_bounds = array<i64: 1, 1, 32>}, {pipeline_mode = #tpu.pipeline_mode<synchronous>, transform_indices = @transform_12, window_bounds = array<i64: 1, 32>}, {pipeline_mode = #tpu.pipeline_mode<synchronous>, transform_indices = @transform_13, window_bounds = array<i64: 1, 32>}, {transform_indices = @transform_14, window_bounds = array<i64: 1, 8, 32>}]} {
    %c0_i32 = arith.constant 0 : i32
    %0 = arith.cmpi eq, %arg1, %c0_i32 : i32
    %1 = arith.extui %0 : i1 to i32
    %c0_i32_0 = arith.constant 0 : i32
    %2 = arith.cmpi ne, %1, %c0_i32_0 : i32
    scf.if %2 {
      %c0_79 = arith.constant 0 : index
      %c0_80 = arith.constant 0 : index
      %c0_81 = arith.constant 0 : index
      %202 = vector.load %arg2[%c0_79, %c0_80, %c0_81] : memref<1x8x32xf32, #tpu.memory_space<vmem>>, vector<1x8x32xf32>
      %203 = vector.shape_cast %202 : vector<1x8x32xf32> to vector<8x32xf32>
      %c0_82 = arith.constant 0 : index
      %c0_83 = arith.constant 0 : index
      %204 = vector.load %arg17[%c0_82, %c0_83] : memref<8x32xf32, #tpu.memory_space<vmem>>, vector<8x32xf32>
      tpu.vector_store %arg17[%c0_82, %c0_83], %203 {strides = array<i32>} : memref<8x32xf32, #tpu.memory_space<vmem>>, vector<8x32xf32>,
    } else {
    }
    %c0 = arith.constant 0 : index
    %c0_1 = arith.constant 0 : index
    %3 = vector.load %arg17[%c0, %c0_1] : memref<8x32xf32, #tpu.memory_space<vmem>>, vector<8x32xf32>
    %c0_2 = arith.constant 0 : index
    %c0_3 = arith.constant 0 : index
    %c0_4 = arith.constant 0 : index
    %4 = vector.load %arg3[%c0_2, %c0_3, %c0_4] : memref<1x1x32xf32, #tpu.memory_space<vmem>>, vector<1x1x32xf32>
    %5 = vector.shape_cast %4 : vector<1x1x32xf32> to vector<1x32xf32>
    %c0_5 = arith.constant 0 : index
    %c0_6 = arith.constant 0 : index
    %c0_7 = arith.constant 0 : index
    %6 = vector.load %arg4[%c0_5, %c0_6, %c0_7] : memref<1x1x32xf32, #tpu.memory_space<vmem>>, vector<1x1x32xf32>
    %7 = vector.shape_cast %6 : vector<1x1x32xf32> to vector<1x32xf32>
    %cst = arith.constant dense<0.000000e+00> : vector<8xf32>
    %8 = vector.multi_reduction <add>, %3, %cst [1] : vector<8x32xf32> to vector<8xf32>
    %9 = vector.shape_cast %8 : vector<8xf32> to vector<8x1xf32>
    %cst_8 = arith.constant 3.200000e+01 : f32
    %10 = vector.broadcast %cst_8 : f32 to vector<8x1xf32>
    %11 = arith.divf %9, %10 : vector<8x1xf32>
    %12 = vector.broadcast %11 : vector<8x1xf32> to vector<8x32xf32>
    %13 = arith.subf %3, %12 : vector<8x32xf32>
    %14 = arith.mulf %13, %13 : vector<8x32xf32>
    %cst_9 = arith.constant dense<0.000000e+00> : vector<8xf32>
    %15 = vector.multi_reduction <add>, %14, %cst_9 [1] : vector<8x32xf32> to vector<8xf32>
    %16 = vector.shape_cast %15 : vector<8xf32> to vector<8x1xf32>
    %cst_10 = arith.constant 3.200000e+01 : f32
    %17 = vector.broadcast %cst_10 : f32 to vector<8x1xf32>
    %18 = arith.divf %16, %17 : vector<8x1xf32>
    %19 = vector.broadcast %11 : vector<8x1xf32> to vector<8x32xf32>
    %20 = arith.subf %3, %19 : vector<8x32xf32>
    %cst_11 = arith.constant 9.99999974E-6 : f32
    %21 = vector.broadcast %cst_11 : f32 to vector<8x1xf32>
    %22 = arith.addf %18, %21 : vector<8x1xf32>
    %23 = math.rsqrt %22 : vector<8x1xf32>
    %24 = vector.broadcast %23 : vector<8x1xf32> to vector<8x32xf32>
    %25 = arith.mulf %20, %24 : vector<8x32xf32>
    %26 = vector.broadcast %5 : vector<1x32xf32> to vector<8x32xf32>
    %27 = arith.mulf %25, %26 : vector<8x32xf32>
    %28 = vector.broadcast %7 : vector<1x32xf32> to vector<8x32xf32>
    %29 = arith.addf %27, %28 : vector<8x32xf32>
    %30 = arith.truncf %29 : vector<8x32xf32> to vector<8x32xbf16>
    %c0_12 = arith.constant 0 : index
    %c0_13 = arith.constant 0 : index
    %c0_14 = arith.constant 0 : index
    %31 = vector.load %arg5[%c0_12, %c0_13, %c0_14] : memref<1x32x192xbf16, #tpu.memory_space<vmem>>, vector<1x32x192xbf16>
    %32 = vector.shape_cast %31 : vector<1x32x192xbf16> to vector<32x192xbf16>
    %cst_15 = arith.constant dense<0.000000e+00> : vector<8x192xf32>
    %33 = tpu.matmul %30, %32, %cst_15 {dimension_numbers = #tpu.dot_dimension_numbers<[1], [0], [0], [1], [0, 0, 1, 1], [], []>} : vector<8x32xbf16>, vector<32x192xbf16>, vector<8x192xf32> -> vector<8x192xf32>
    %c0_16 = arith.constant 0 : index
    %c0_17 = arith.constant 0 : index
    %c0_18 = arith.constant 0 : index
    %34 = vector.load %arg6[%c0_16, %c0_17, %c0_18] : memref<1x64x32xbf16, #tpu.memory_space<vmem>>, vector<1x64x32xbf16>
    %35 = vector.shape_cast %34 : vector<1x64x32xbf16> to vector<64x32xbf16>
    %cst_19 = arith.constant 0.000000e+00 : f32
    %36 = vector.broadcast %cst_19 : f32 to vector<8x32xf32>
    %37 = vector.extract_strided_slice %33 {offsets = [0, 0], sizes = [8, 16], strides = [1, 1]} : vector<8x192xf32> to vector<8x16xf32>
    %cst_20 = arith.constant 2.500000e-01 : f32
    %38 = vector.broadcast %cst_20 : f32 to vector<8x16xf32>
    %39 = arith.mulf %37, %38 : vector<8x16xf32>
    %40 = vector.extract_strided_slice %33 {offsets = [0, 64], sizes = [8, 16], strides = [1, 1]} : vector<8x192xf32> to vector<8x16xf32>
    %41 = vector.extract_strided_slice %33 {offsets = [0, 128], sizes = [8, 16], strides = [1, 1]} : vector<8x192xf32> to vector<8x16xf32>
    %42 = arith.truncf %39 : vector<8x16xf32> to vector<8x16xbf16>
    %43 = arith.truncf %40 : vector<8x16xf32> to vector<8x16xbf16>
    %cst_21 = arith.constant dense<0.000000e+00> : vector<8x8xf32>
    %44 = tpu.matmul %42, %43, %cst_21 {dimension_numbers = #tpu.dot_dimension_numbers<[1], [1], [0], [0], [0, 0, 1, 0], [], []>} : vector<8x16xbf16>, vector<8x16xbf16>, vector<8x8xf32> -> vector<8x8xf32>
    %cst_22 = arith.constant dense<0xFF800000> : vector<8xf32>
    %45 = vector.multi_reduction <maximumf>, %44, %cst_22 [1] : vector<8x8xf32> to vector<8xf32>
    %46 = vector.shape_cast %45 : vector<8xf32> to vector<8x1xf32>
    %47 = vector.broadcast %46 : vector<8x1xf32> to vector<8x8xf32>
    %48 = arith.subf %44, %47 : vector<8x8xf32>
    %49 = math.exp %48 : vector<8x8xf32>
    %cst_23 = arith.constant dense<0.000000e+00> : vector<8xf32>
    %50 = vector.multi_reduction <add>, %49, %cst_23 [1] : vector<8x8xf32> to vector<8xf32>
    %51 = vector.shape_cast %50 : vector<8xf32> to vector<8x1xf32>
    %52 = tpu.reciprocal %51 {approx = true} : vector<8x1xf32> -> vector<8x1xf32>
    %53 = vector.broadcast %52 : vector<8x1xf32> to vector<8x8xf32>
    %54 = arith.mulf %49, %53 : vector<8x8xf32>
    %55 = arith.truncf %54 : vector<8x8xf32> to vector<8x8xbf16>
    %56 = arith.truncf %41 : vector<8x16xf32> to vector<8x16xbf16>
    %cst_24 = arith.constant dense<0.000000e+00> : vector<8x16xf32>
    %57 = tpu.matmul %55, %56, %cst_24 {dimension_numbers = #tpu.dot_dimension_numbers<[1], [0], [0], [1], [0, 0, 1, 1], [], []>} : vector<8x8xbf16>, vector<8x16xbf16>, vector<8x16xf32> -> vector<8x16xf32>
    %58 = arith.truncf %57 : vector<8x16xf32> to vector<8x16xbf16>
    %59 = vector.extract_strided_slice %35 {offsets = [0, 0], sizes = [16, 32], strides = [1, 1]} : vector<64x32xbf16> to vector<16x32xbf16>
    %cst_25 = arith.constant dense<0.000000e+00> : vector<8x32xf32>
    %60 = tpu.matmul %58, %59, %cst_25 {dimension_numbers = #tpu.dot_dimension_numbers<[1], [0], [0], [1], [0, 0, 1, 1], [], []>} : vector<8x16xbf16>, vector<16x32xbf16>, vector<8x32xf32> -> vector<8x32xf32>
    %61 = arith.addf %36, %60 : vector<8x32xf32>
    %62 = vector.extract_strided_slice %33 {offsets = [0, 16], sizes = [8, 16], strides = [1, 1]} : vector<8x192xf32> to vector<8x16xf32>
    %cst_26 = arith.constant 2.500000e-01 : f32
    %63 = vector.broadcast %cst_26 : f32 to vector<8x16xf32>
    %64 = arith.mulf %62, %63 : vector<8x16xf32>
    %65 = vector.extract_strided_slice %33 {offsets = [0, 80], sizes = [8, 16], strides = [1, 1]} : vector<8x192xf32> to vector<8x16xf32>
    %66 = vector.extract_strided_slice %33 {offsets = [0, 144], sizes = [8, 16], strides = [1, 1]} : vector<8x192xf32> to vector<8x16xf32>
    %67 = arith.truncf %64 : vector<8x16xf32> to vector<8x16xbf16>
    %68 = arith.truncf %65 : vector<8x16xf32> to vector<8x16xbf16>
    %cst_27 = arith.constant dense<0.000000e+00> : vector<8x8xf32>
    %69 = tpu.matmul %67, %68, %cst_27 {dimension_numbers = #tpu.dot_dimension_numbers<[1], [1], [0], [0], [0, 0, 1, 0], [], []>} : vector<8x16xbf16>, vector<8x16xbf16>, vector<8x8xf32> -> vector<8x8xf32>
    %cst_28 = arith.constant dense<0xFF800000> : vector<8xf32>
    %70 = vector.multi_reduction <maximumf>, %69, %cst_28 [1] : vector<8x8xf32> to vector<8xf32>
    %71 = vector.shape_cast %70 : vector<8xf32> to vector<8x1xf32>
    %72 = vector.broadcast %71 : vector<8x1xf32> to vector<8x8xf32>
    %73 = arith.subf %69, %72 : vector<8x8xf32>
    %74 = math.exp %73 : vector<8x8xf32>
    %cst_29 = arith.constant dense<0.000000e+00> : vector<8xf32>
    %75 = vector.multi_reduction <add>, %74, %cst_29 [1] : vector<8x8xf32> to vector<8xf32>
    %76 = vector.shape_cast %75 : vector<8xf32> to vector<8x1xf32>
    %77 = tpu.reciprocal %76 {approx = true} : vector<8x1xf32> -> vector<8x1xf32>
    %78 = vector.broadcast %77 : vector<8x1xf32> to vector<8x8xf32>
    %79 = arith.mulf %74, %78 : vector<8x8xf32>
    %80 = arith.truncf %79 : vector<8x8xf32> to vector<8x8xbf16>
    %81 = arith.truncf %66 : vector<8x16xf32> to vector<8x16xbf16>
    %cst_30 = arith.constant dense<0.000000e+00> : vector<8x16xf32>
    %82 = tpu.matmul %80, %81, %cst_30 {dimension_numbers = #tpu.dot_dimension_numbers<[1], [0], [0], [1], [0, 0, 1, 1], [], []>} : vector<8x8xbf16>, vector<8x16xbf16>, vector<8x16xf32> -> vector<8x16xf32>
    %83 = arith.truncf %82 : vector<8x16xf32> to vector<8x16xbf16>
    %84 = vector.extract_strided_slice %35 {offsets = [16, 0], sizes = [16, 32], strides = [1, 1]} : vector<64x32xbf16> to vector<16x32xbf16>
    %cst_31 = arith.constant dense<0.000000e+00> : vector<8x32xf32>
    %85 = tpu.matmul %83, %84, %cst_31 {dimension_numbers = #tpu.dot_dimension_numbers<[1], [0], [0], [1], [0, 0, 1, 1], [], []>} : vector<8x16xbf16>, vector<16x32xbf16>, vector<8x32xf32> -> vector<8x32xf32>
    %86 = arith.addf %61, %85 : vector<8x32xf32>
    %87 = vector.extract_strided_slice %33 {offsets = [0, 32], sizes = [8, 16], strides = [1, 1]} : vector<8x192xf32> to vector<8x16xf32>
    %cst_32 = arith.constant 2.500000e-01 : f32
    %88 = vector.broadcast %cst_32 : f32 to vector<8x16xf32>
    %89 = arith.mulf %87, %88 : vector<8x16xf32>
    %90 = vector.extract_strided_slice %33 {offsets = [0, 96], sizes = [8, 16], strides = [1, 1]} : vector<8x192xf32> to vector<8x16xf32>
    %91 = vector.extract_strided_slice %33 {offsets = [0, 160], sizes = [8, 16], strides = [1, 1]} : vector<8x192xf32> to vector<8x16xf32>
    %92 = arith.truncf %89 : vector<8x16xf32> to vector<8x16xbf16>
    %93 = arith.truncf %90 : vector<8x16xf32> to vector<8x16xbf16>
    %cst_33 = arith.constant dense<0.000000e+00> : vector<8x8xf32>
    %94 = tpu.matmul %92, %93, %cst_33 {dimension_numbers = #tpu.dot_dimension_numbers<[1], [1], [0], [0], [0, 0, 1, 0], [], []>} : vector<8x16xbf16>, vector<8x16xbf16>, vector<8x8xf32> -> vector<8x8xf32>
    %cst_34 = arith.constant dense<0xFF800000> : vector<8xf32>
    %95 = vector.multi_reduction <maximumf>, %94, %cst_34 [1] : vector<8x8xf32> to vector<8xf32>
    %96 = vector.shape_cast %95 : vector<8xf32> to vector<8x1xf32>
    %97 = vector.broadcast %96 : vector<8x1xf32> to vector<8x8xf32>
    %98 = arith.subf %94, %97 : vector<8x8xf32>
    %99 = math.exp %98 : vector<8x8xf32>
    %cst_35 = arith.constant dense<0.000000e+00> : vector<8xf32>
    %100 = vector.multi_reduction <add>, %99, %cst_35 [1] : vector<8x8xf32> to vector<8xf32>
    %101 = vector.shape_cast %100 : vector<8xf32> to vector<8x1xf32>
    %102 = tpu.reciprocal %101 {approx = true} : vector<8x1xf32> -> vector<8x1xf32>
    %103 = vector.broadcast %102 : vector<8x1xf32> to vector<8x8xf32>
    %104 = arith.mulf %99, %103 : vector<8x8xf32>
    %105 = arith.truncf %104 : vector<8x8xf32> to vector<8x8xbf16>
    %106 = arith.truncf %91 : vector<8x16xf32> to vector<8x16xbf16>
    %cst_36 = arith.constant dense<0.000000e+00> : vector<8x16xf32>
    %107 = tpu.matmul %105, %106, %cst_36 {dimension_numbers = #tpu.dot_dimension_numbers<[1], [0], [0], [1], [0, 0, 1, 1], [], []>} : vector<8x8xbf16>, vector<8x16xbf16>, vector<8x16xf32> -> vector<8x16xf32>
    %108 = arith.truncf %107 : vector<8x16xf32> to vector<8x16xbf16>
    %109 = vector.extract_strided_slice %35 {offsets = [32, 0], sizes = [16, 32], strides = [1, 1]} : vector<64x32xbf16> to vector<16x32xbf16>
    %cst_37 = arith.constant dense<0.000000e+00> : vector<8x32xf32>
    %110 = tpu.matmul %108, %109, %cst_37 {dimension_numbers = #tpu.dot_dimension_numbers<[1], [0], [0], [1], [0, 0, 1, 1], [], []>} : vector<8x16xbf16>, vector<16x32xbf16>, vector<8x32xf32> -> vector<8x32xf32>
    %111 = arith.addf %86, %110 : vector<8x32xf32>
    %112 = vector.extract_strided_slice %33 {offsets = [0, 48], sizes = [8, 16], strides = [1, 1]} : vector<8x192xf32> to vector<8x16xf32>
    %cst_38 = arith.constant 2.500000e-01 : f32
    %113 = vector.broadcast %cst_38 : f32 to vector<8x16xf32>
    %114 = arith.mulf %112, %113 : vector<8x16xf32>
    %115 = vector.extract_strided_slice %33 {offsets = [0, 112], sizes = [8, 16], strides = [1, 1]} : vector<8x192xf32> to vector<8x16xf32>
    %116 = vector.extract_strided_slice %33 {offsets = [0, 176], sizes = [8, 16], strides = [1, 1]} : vector<8x192xf32> to vector<8x16xf32>
    %117 = arith.truncf %114 : vector<8x16xf32> to vector<8x16xbf16>
    %118 = arith.truncf %115 : vector<8x16xf32> to vector<8x16xbf16>
    %cst_39 = arith.constant dense<0.000000e+00> : vector<8x8xf32>
    %119 = tpu.matmul %117, %118, %cst_39 {dimension_numbers = #tpu.dot_dimension_numbers<[1], [1], [0], [0], [0, 0, 1, 0], [], []>} : vector<8x16xbf16>, vector<8x16xbf16>, vector<8x8xf32> -> vector<8x8xf32>
    %cst_40 = arith.constant dense<0xFF800000> : vector<8xf32>
    %120 = vector.multi_reduction <maximumf>, %119, %cst_40 [1] : vector<8x8xf32> to vector<8xf32>
    %121 = vector.shape_cast %120 : vector<8xf32> to vector<8x1xf32>
    %122 = vector.broadcast %121 : vector<8x1xf32> to vector<8x8xf32>
    %123 = arith.subf %119, %122 : vector<8x8xf32>
    %124 = math.exp %123 : vector<8x8xf32>
    %cst_41 = arith.constant dense<0.000000e+00> : vector<8xf32>
    %125 = vector.multi_reduction <add>, %124, %cst_41 [1] : vector<8x8xf32> to vector<8xf32>
    %126 = vector.shape_cast %125 : vector<8xf32> to vector<8x1xf32>
    %127 = tpu.reciprocal %126 {approx = true} : vector<8x1xf32> -> vector<8x1xf32>
    %128 = vector.broadcast %127 : vector<8x1xf32> to vector<8x8xf32>
    %129 = arith.mulf %124, %128 : vector<8x8xf32>
    %130 = arith.truncf %129 : vector<8x8xf32> to vector<8x8xbf16>
    %131 = arith.truncf %116 : vector<8x16xf32> to vector<8x16xbf16>
    %cst_42 = arith.constant dense<0.000000e+00> : vector<8x16xf32>
    %132 = tpu.matmul %130, %131, %cst_42 {dimension_numbers = #tpu.dot_dimension_numbers<[1], [0], [0], [1], [0, 0, 1, 1], [], []>} : vector<8x8xbf16>, vector<8x16xbf16>, vector<8x16xf32> -> vector<8x16xf32>
    %133 = arith.truncf %132 : vector<8x16xf32> to vector<8x16xbf16>
    %134 = vector.extract_strided_slice %35 {offsets = [48, 0], sizes = [16, 32], strides = [1, 1]} : vector<64x32xbf16> to vector<16x32xbf16>
    %cst_43 = arith.constant dense<0.000000e+00> : vector<8x32xf32>
    %135 = tpu.matmul %133, %134, %cst_43 {dimension_numbers = #tpu.dot_dimension_numbers<[1], [0], [0], [1], [0, 0, 1, 1], [], []>} : vector<8x16xbf16>, vector<16x32xbf16>, vector<8x32xf32> -> vector<8x32xf32>
    %136 = arith.addf %111, %135 : vector<8x32xf32>
    %c0_44 = arith.constant 0 : index
    %c0_45 = arith.constant 0 : index
    %c0_46 = arith.constant 0 : index
    %137 = vector.load %arg7[%c0_44, %c0_45, %c0_46] : memref<1x1x32xf32, #tpu.memory_space<vmem>>, vector<1x1x32xf32>
    %138 = vector.shape_cast %137 : vector<1x1x32xf32> to vector<1x32xf32>
    %139 = vector.broadcast %138 : vector<1x32xf32> to vector<8x32xf32>
    %140 = arith.addf %136, %139 : vector<8x32xf32>
    %141 = arith.addf %140, %3 : vector<8x32xf32>
    %c0_47 = arith.constant 0 : index
    %c0_48 = arith.constant 0 : index
    %c0_49 = arith.constant 0 : index
    %142 = vector.load %arg8[%c0_47, %c0_48, %c0_49] : memref<1x1x32xf32, #tpu.memory_space<vmem>>, vector<1x1x32xf32>
    %143 = vector.shape_cast %142 : vector<1x1x32xf32> to vector<1x32xf32>
    %c0_50 = arith.constant 0 : index
    %c0_51 = arith.constant 0 : index
    %c0_52 = arith.constant 0 : index
    %144 = vector.load %arg9[%c0_50, %c0_51, %c0_52] : memref<1x1x32xf32, #tpu.memory_space<vmem>>, vector<1x1x32xf32>
    %145 = vector.shape_cast %144 : vector<1x1x32xf32> to vector<1x32xf32>
    %cst_53 = arith.constant dense<0.000000e+00> : vector<8xf32>
    %146 = vector.multi_reduction <add>, %141, %cst_53 [1] : vector<8x32xf32> to vector<8xf32>
    %147 = vector.shape_cast %146 : vector<8xf32> to vector<8x1xf32>
    %cst_54 = arith.constant 3.200000e+01 : f32
    %148 = vector.broadcast %cst_54 : f32 to vector<8x1xf32>
    %149 = arith.divf %147, %148 : vector<8x1xf32>
    %150 = vector.broadcast %149 : vector<8x1xf32> to vector<8x32xf32>
    %151 = arith.subf %141, %150 : vector<8x32xf32>
    %152 = arith.mulf %151, %151 : vector<8x32xf32>
    %cst_55 = arith.constant dense<0.000000e+00> : vector<8xf32>
    %153 = vector.multi_reduction <add>, %152, %cst_55 [1] : vector<8x32xf32> to vector<8xf32>
    %154 = vector.shape_cast %153 : vector<8xf32> to vector<8x1xf32>
    %cst_56 = arith.constant 3.200000e+01 : f32
    %155 = vector.broadcast %cst_56 : f32 to vector<8x1xf32>
    %156 = arith.divf %154, %155 : vector<8x1xf32>
    %157 = vector.broadcast %149 : vector<8x1xf32> to vector<8x32xf32>
    %158 = arith.subf %141, %157 : vector<8x32xf32>
    %cst_57 = arith.constant 9.99999974E-6 : f32
    %159 = vector.broadcast %cst_57 : f32 to vector<8x1xf32>
    %160 = arith.addf %156, %159 : vector<8x1xf32>
    %161 = math.rsqrt %160 : vector<8x1xf32>
    %162 = vector.broadcast %161 : vector<8x1xf32> to vector<8x32xf32>
    %163 = arith.mulf %158, %162 : vector<8x32xf32>
    %164 = vector.broadcast %143 : vector<1x32xf32> to vector<8x32xf32>
    %165 = arith.mulf %163, %164 : vector<8x32xf32>
    %166 = vector.broadcast %145 : vector<1x32xf32> to vector<8x32xf32>
    %167 = arith.addf %165, %166 : vector<8x32xf32>
    %168 = arith.truncf %167 : vector<8x32xf32> to vector<8x32xbf16>
    %c0_58 = arith.constant 0 : index
    %c0_59 = arith.constant 0 : index
    %c0_60 = arith.constant 0 : index
    %169 = vector.load %arg10[%c0_58, %c0_59, %c0_60] : memref<1x32x64xbf16, #tpu.memory_space<vmem>>, vector<1x32x64xbf16>
    %170 = vector.shape_cast %169 : vector<1x32x64xbf16> to vector<32x64xbf16>
    %cst_61 = arith.constant dense<0.000000e+00> : vector<8x64xf32>
    %171 = tpu.matmul %168, %170, %cst_61 {dimension_numbers = #tpu.dot_dimension_numbers<[1], [0], [0], [1], [0, 0, 1, 1], [], []>} : vector<8x32xbf16>, vector<32x64xbf16>, vector<8x64xf32> -> vector<8x64xf32>
    %c0_62 = arith.constant 0 : index
    %c0_63 = arith.constant 0 : index
    %c0_64 = arith.constant 0 : index
    %172 = vector.load %arg11[%c0_62, %c0_63, %c0_64] : memref<1x1x64xf32, #tpu.memory_space<vmem>>, vector<1x1x64xf32>
    %173 = vector.shape_cast %172 : vector<1x1x64xf32> to vector<1x64xf32>
    %174 = vector.broadcast %173 : vector<1x64xf32> to vector<8x64xf32>
    %175 = arith.addf %171, %174 : vector<8x64xf32>
    %cst_65 = arith.constant 5.000000e-01 : f32
    %176 = vector.broadcast %cst_65 : f32 to vector<8x64xf32>
    %177 = arith.mulf %176, %175 : vector<8x64xf32>
    %cst_66 = arith.constant 4.471500e-02 : f32
    %178 = vector.broadcast %cst_66 : f32 to vector<8x64xf32>
    %179 = arith.mulf %178, %175 : vector<8x64xf32>
    %180 = arith.mulf %179, %175 : vector<8x64xf32>
    %181 = arith.mulf %180, %175 : vector<8x64xf32>
    %182 = arith.addf %175, %181 : vector<8x64xf32>
    %cst_67 = arith.constant 0.797884583 : f32
    %183 = vector.broadcast %cst_67 : f32 to vector<8x64xf32>
    %184 = arith.mulf %183, %182 : vector<8x64xf32>
    %185 = math.tanh %184 : vector<8x64xf32>
    %cst_68 = arith.constant 1.000000e+00 : f32
    %186 = vector.broadcast %cst_68 : f32 to vector<8x64xf32>
    %187 = arith.addf %186, %185 : vector<8x64xf32>
    %188 = arith.mulf %177, %187 : vector<8x64xf32>
    %189 = arith.truncf %188 : vector<8x64xf32> to vector<8x64xbf16>
    %c0_69 = arith.constant 0 : index
    %c0_70 = arith.constant 0 : index
    %c0_71 = arith.constant 0 : index
    %190 = vector.load %arg12[%c0_69, %c0_70, %c0_71] : memref<1x64x32xbf16, #tpu.memory_space<vmem>>, vector<1x64x32xbf16>
    %191 = vector.shape_cast %190 : vector<1x64x32xbf16> to vector<64x32xbf16>
    %cst_72 = arith.constant dense<0.000000e+00> : vector<8x32xf32>
    %192 = tpu.matmul %189, %191, %cst_72 {dimension_numbers = #tpu.dot_dimension_numbers<[1], [0], [0], [1], [0, 0, 1, 1], [], []>} : vector<8x64xbf16>, vector<64x32xbf16>, vector<8x32xf32> -> vector<8x32xf32>
    %c0_73 = arith.constant 0 : index
    %c0_74 = arith.constant 0 : index
    %c0_75 = arith.constant 0 : index
    %193 = vector.load %arg13[%c0_73, %c0_74, %c0_75] : memref<1x1x32xf32, #tpu.memory_space<vmem>>, vector<1x1x32xf32>
    %194 = vector.shape_cast %193 : vector<1x1x32xf32> to vector<1x32xf32>
    %195 = vector.broadcast %194 : vector<1x32xf32> to vector<8x32xf32>
    %196 = arith.addf %192, %195 : vector<8x32xf32>
    %197 = arith.addf %196, %141 : vector<8x32xf32>
    %c0_76 = arith.constant 0 : index
    %c0_77 = arith.constant 0 : index
    %198 = vector.load %arg17[%c0_76, %c0_77] : memref<8x32xf32, #tpu.memory_space<vmem>>, vector<8x32xf32>
    tpu.vector_store %arg17[%c0_76, %c0_77], %197 {strides = array<i32>} : memref<8x32xf32, #tpu.memory_space<vmem>>, vector<8x32xf32>,
    %c1_i32 = arith.constant 1 : i32
    %199 = arith.cmpi eq, %arg1, %c1_i32 : i32
    %200 = arith.extui %199 : i1 to i32
    %c0_i32_78 = arith.constant 0 : i32
    %201 = arith.cmpi ne, %200, %c0_i32_78 : i32
    scf.if %201 {
      %c0_79 = arith.constant 0 : index
      %c0_80 = arith.constant 0 : index
      %202 = vector.load %arg14[%c0_79, %c0_80] : memref<1x32xf32, #tpu.memory_space<vmem>>, vector<1x32xf32>
      %c0_81 = arith.constant 0 : index
      %c0_82 = arith.constant 0 : index
      %203 = vector.load %arg15[%c0_81, %c0_82] : memref<1x32xf32, #tpu.memory_space<vmem>>, vector<1x32xf32>
      %cst_83 = arith.constant dense<0.000000e+00> : vector<8xf32>
      %204 = vector.multi_reduction <add>, %197, %cst_83 [1] : vector<8x32xf32> to vector<8xf32>
      %205 = vector.shape_cast %204 : vector<8xf32> to vector<8x1xf32>
      %cst_84 = arith.constant 3.200000e+01 : f32
      %206 = vector.broadcast %cst_84 : f32 to vector<8x1xf32>
      %207 = arith.divf %205, %206 : vector<8x1xf32>
      %208 = vector.broadcast %207 : vector<8x1xf32> to vector<8x32xf32>
      %209 = arith.subf %197, %208 : vector<8x32xf32>
      %210 = arith.mulf %209, %209 : vector<8x32xf32>
      %cst_85 = arith.constant dense<0.000000e+00> : vector<8xf32>
      %211 = vector.multi_reduction <add>, %210, %cst_85 [1] : vector<8x32xf32> to vector<8xf32>
      %212 = vector.shape_cast %211 : vector<8xf32> to vector<8x1xf32>
      %cst_86 = arith.constant 3.200000e+01 : f32
      %213 = vector.broadcast %cst_86 : f32 to vector<8x1xf32>
      %214 = arith.divf %212, %213 : vector<8x1xf32>
      %215 = vector.broadcast %207 : vector<8x1xf32> to vector<8x32xf32>
      %216 = arith.subf %197, %215 : vector<8x32xf32>
      %cst_87 = arith.constant 9.99999974E-6 : f32
      %217 = vector.broadcast %cst_87 : f32 to vector<8x1xf32>
      %218 = arith.addf %214, %217 : vector<8x1xf32>
      %219 = math.rsqrt %218 : vector<8x1xf32>
      %220 = vector.broadcast %219 : vector<8x1xf32> to vector<8x32xf32>
      %221 = arith.mulf %216, %220 : vector<8x32xf32>
      %222 = vector.broadcast %202 : vector<1x32xf32> to vector<8x32xf32>
      %223 = arith.mulf %221, %222 : vector<8x32xf32>
      %224 = vector.broadcast %203 : vector<1x32xf32> to vector<8x32xf32>
      %225 = arith.addf %223, %224 : vector<8x32xf32>
      %c0_88 = arith.constant 0 : index
      %c0_89 = arith.constant 0 : index
      %c0_90 = arith.constant 0 : index
      %226 = vector.load %arg16[%c0_88, %c0_89, %c0_90] : memref<1x8x32xf32, #tpu.memory_space<vmem>>, vector<1x8x32xf32>
      %227 = vector.shape_cast %226 : vector<1x8x32xf32> to vector<8x32xf32>
      %228 = vector.shape_cast %225 : vector<8x32xf32> to vector<1x8x32xf32>
      tpu.vector_store %arg16[%c0_88, %c0_89, %c0_90], %228 {strides = array<i32>} : memref<1x8x32xf32, #tpu.memory_space<vmem>>, vector<1x8x32xf32>,
    } else {
    }
    return
  }
  func.func @transform_0(%arg0: i32, %arg1: i32) -> (i32, i32, i32) {
    %c0_i32 = arith.constant 0 : i32
    %c0_i32_0 = arith.constant 0 : i32
    %c0_i32_1 = arith.constant 0 : i32
    return %arg0, %c0_i32, %c0_i32_0 : i32, i32, i32
  }
  func.func @transform_1(%arg0: i32, %arg1: i32) -> (i32, i32, i32) {
    %c0_i32 = arith.constant 0 : i32
    %c0_i32_0 = arith.constant 0 : i32
    %c0_i32_1 = arith.constant 0 : i32
    return %arg1, %c0_i32, %c0_i32_0 : i32, i32, i32
  }
  func.func @transform_2(%arg0: i32, %arg1: i32) -> (i32, i32, i32) {
    %c0_i32 = arith.constant 0 : i32
    %c0_i32_0 = arith.constant 0 : i32
    %c0_i32_1 = arith.constant 0 : i32
    return %arg1, %c0_i32, %c0_i32_0 : i32, i32, i32
  }
  func.func @transform_3(%arg0: i32, %arg1: i32) -> (i32, i32, i32) {
    %c0_i32 = arith.constant 0 : i32
    %c0_i32_0 = arith.constant 0 : i32
    %c0_i32_1 = arith.constant 0 : i32
    return %arg1, %c0_i32, %c0_i32_0 : i32, i32, i32
  }
  func.func @transform_4(%arg0: i32, %arg1: i32) -> (i32, i32, i32) {
    %c0_i32 = arith.constant 0 : i32
    %c0_i32_0 = arith.constant 0 : i32
    %c0_i32_1 = arith.constant 0 : i32
    return %arg1, %c0_i32, %c0_i32_0 : i32, i32, i32
  }
  func.func @transform_5(%arg0: i32, %arg1: i32) -> (i32, i32, i32) {
    %c0_i32 = arith.constant 0 : i32
    %c0_i32_0 = arith.constant 0 : i32
    %c0_i32_1 = arith.constant 0 : i32
    return %arg1, %c0_i32, %c0_i32_0 : i32, i32, i32
  }
  func.func @transform_6(%arg0: i32, %arg1: i32) -> (i32, i32, i32) {
    %c0_i32 = arith.constant 0 : i32
    %c0_i32_0 = arith.constant 0 : i32
    %c0_i32_1 = arith.constant 0 : i32
    return %arg1, %c0_i32, %c0_i32_0 : i32, i32, i32
  }
  func.func @transform_7(%arg0: i32, %arg1: i32) -> (i32, i32, i32) {
    %c0_i32 = arith.constant 0 : i32
    %c0_i32_0 = arith.constant 0 : i32
    %c0_i32_1 = arith.constant 0 : i32
    return %arg1, %c0_i32, %c0_i32_0 : i32, i32, i32
  }
  func.func @transform_8(%arg0: i32, %arg1: i32) -> (i32, i32, i32) {
    %c0_i32 = arith.constant 0 : i32
    %c0_i32_0 = arith.constant 0 : i32
    %c0_i32_1 = arith.constant 0 : i32
    return %arg1, %c0_i32, %c0_i32_0 : i32, i32, i32
  }
  func.func @transform_9(%arg0: i32, %arg1: i32) -> (i32, i32, i32) {
    %c0_i32 = arith.constant 0 : i32
    %c0_i32_0 = arith.constant 0 : i32
    %c0_i32_1 = arith.constant 0 : i32
    return %arg1, %c0_i32, %c0_i32_0 : i32, i32, i32
  }
  func.func @transform_10(%arg0: i32, %arg1: i32) -> (i32, i32, i32) {
    %c0_i32 = arith.constant 0 : i32
    %c0_i32_0 = arith.constant 0 : i32
    %c0_i32_1 = arith.constant 0 : i32
    return %arg1, %c0_i32, %c0_i32_0 : i32, i32, i32
  }
  func.func @transform_11(%arg0: i32, %arg1: i32) -> (i32, i32, i32) {
    %c0_i32 = arith.constant 0 : i32
    %c0_i32_0 = arith.constant 0 : i32
    %c0_i32_1 = arith.constant 0 : i32
    return %arg1, %c0_i32, %c0_i32_0 : i32, i32, i32
  }
  func.func @transform_12(%arg0: i32, %arg1: i32) -> (i32, i32) {
    %c0_i32 = arith.constant 0 : i32
    %c0_i32_0 = arith.constant 0 : i32
    %c0_i32_1 = arith.constant 0 : i32
    return %c0_i32, %c0_i32_0 : i32, i32
  }
  func.func @transform_13(%arg0: i32, %arg1: i32) -> (i32, i32) {
    %c0_i32 = arith.constant 0 : i32
    %c0_i32_0 = arith.constant 0 : i32
    %c0_i32_1 = arith.constant 0 : i32
    return %c0_i32, %c0_i32_0 : i32, i32
  }
  func.func @transform_14(%arg0: i32, %arg1: i32) -> (i32, i32, i32) {
    %c0_i32 = arith.constant 0 : i32
    %c0_i32_0 = arith.constant 0 : i32
    %c0_i32_1 = arith.constant 0 : i32
    return %arg0, %c0_i32, %c0_i32_0 : i32, i32, i32
  }
}

</mosaic_0001>

<bundles_post_ra>
// kernel: transformer_forward.1
= control target key start
LH: loop header
LB: loop body
LE: loop exit
PB: predicated region body
PF: predicated region fallthrough
CT: control target
= control target key end

     0   :  { %s2692_s0 = inlined_call_operand.vmem [shape: f32[2,8,32], index: 0, kind: input, shape index: {}]   ;;  %s2693_s1 = inlined_call_operand.vmem [shape: f32[2,1,32], index: 1, kind: input, shape index: {}]   ;;  %s2694_s2 = inlined_call_operand.vmem [shape: f32[2,1,32], index: 2, kind: input, shape index: {}]   ;;  %s2695_s3 = inlined_call_operand.vmem [shape: bf16[2,32,192], index: 3, kind: input, shape index: {}]   ;;  %s2696_s4 = inlined_call_operand.vmem [shape: bf16[2,64,32], index: 4, kind: input, shape index: {}]   ;;  %s2697_s5 = inlined_call_operand.vmem [shape: f32[2,1,32], index: 5, kind: input, shape index: {}]   ;;  %s2698_s6 = inlined_call_operand.vmem [shape: f32[2,1,32], index: 6, kind: input, shape index: {}]   ;;  %s2699_s7 = inlined_call_operand.vmem [shape: f32[2,1,32], index: 7, kind: input, shape index: {}]   ;;  %s2700_s8 = inlined_call_operand.vmem [shape: bf16[2,32,64], index: 8, kind: input, shape index: {}]   ;;  %s2701_s9 = inlined_call_operand.vmem [shape: f32[2,1,64], index: 9, kind: input, shape index: {}]   ;;  %s2702_s10 = inlined_call_operand.vmem [shape: bf16[2,64,32], index: 10, kind: input, shape index: {}]   ;;  %s2703_s11 = inlined_call_operand.vmem [shape: f32[2,1,32], index: 11, kind: input, shape index: {}]   ;;  %s2704_s12 = inlined_call_operand.vmem [shape: f32[1,32], index: 12, kind: input, shape index: {}]   ;;  %s2705_s13 = inlined_call_operand.vmem [shape: f32[1,32], index: 13, kind: input, shape index: {}]   ;;  %s2706_s14 = inlined_call_operand.hbm [shape: f32[2,8,32], index: 14, kind: output, shape index: {}]  }
   0x1   :  { %2722 = sst [smem:[#allocation19_spill]] %s2692_s0 }
   0x2   :  { %2723 = sst [smem:[#allocation20_spill]] %s2695_s3 }
   0x3   :  { %2724 = sst [smem:[#allocation21_spill]] %s2696_s4 }
   0x4   :  { %2725 = sst [smem:[#allocation22_spill]] %s2704_s12 }
   0x5   :  { %2726 = sst [smem:[#allocation23_spill]] %s2705_s13 }
   0x6   :  { %2727 = sst [smem:[#allocation24_spill]] %s2706_s14 }
   0x7   :  { %19 = vsyncpa [#allocation4], 0 }
   0x8   :  { %21 = vsyncpa [#allocation4 + $0x1], 0  ;;  %s2335_s29 = smov 0   ;;  %s2337_s30 = smov 0  }
   0x9   :  { %s2339_s15 = smov 0   ;;  %s2341_s16 = smov 0  }
   0xa   :  { %s2343_s17 = smov 0   ;;  %s2345_s18 = smov 0  }
   0xb   :  { %s2347_s19 = smov 0   ;;  %s2349_s20 = smov 0  }
   0xc LB: > { %2728 = sst [smem:[#allocation6_spill]] %s2219_s29  ;;  %s1847_s21 = sadd.s32 4294967295, %s2247_s20   ;;  %s2247_s20 = sphi %s2349_s20, %s27_s20   ;;  %s2243_s19 = sphi %s2347_s19, %s2769_s19   ;;  %s2239_s18 = sphi %s2345_s18, %s2768_s18   ;;  %s2235_s17 = sphi %s2343_s17, %s2767_s17   ;;  %s2231_s16 = sphi %s2341_s16, %s2766_s16   ;;  %s2227_s15 = sphi %s2339_s15, %s2765_s15   ;;  %s2223_s30 = sphi %s2337_s30, %s2764_s30   ;;  %s2219_s29 = sphi %s2335_s29, %s2763_s29  }
   0xd   : > { %2729 = sst [smem:[#allocation7_spill]] %s2223_s30  ;;  %s1848_s22 = sadd.s32 4294967294, %s2247_s20  }
   0xe   : > { %2730 = sst [smem:[#allocation8_spill]] %s2227_s15  ;;  %s36_s23 = sadd.s32 1, %s2239_s18 }
   0xf   : > { %2731 = sst [smem:[#allocation9_spill]] %s2231_s16  ;;  %p37_p0 = scmp.ge.s32.totalorder %s36_s23, 2 }
  0x10   : > { %2732 = sst [smem:[#allocation10_spill]] %s2235_s17  ;;  %s39_s24 = sadd.s32 1, %s2243_s19 }
  0x11   : > { %2733 = sst [smem:[#allocation11_spill]] %s2239_s18  ;;  %p410_p1 = scmp.ne.s32.totalorder %s2227_s15, %s2223_s30 }
  0x12   : > { %2734 = sst [smem:[#allocation12_spill]] %s2243_s19  ;;  %p411_p2 = scmp.eq.s32.totalorder %s1847_s21, 3 }
  0x13   : > { %2735 = sst [smem:[#allocation13_spill]] %s2247_s20  ;;  %s2771_s23 = smov (%p37_p0, %s36_s23), 0 }
  0x14   : > { %2736 = sst [smem:[#allocation14_spill]] %s2771_s23  ;;  %s2773_s24 = smov (!%p37_p0, %s39_s24), %s2243_s19 }
  0x15   : > { %p2384_p3 = por %p411_p2, %p410_p1  ;;  %p416_p4 = scmp.ne.s32.totalorder %s2223_s30, %s2219_s29 }
  0x16   : > { %p41_p5 = scmp.ge.s32.totalorder %s2773_s24, 2  ;;  %p417_p6 = scmp.eq.s32.totalorder %s1848_s22, 3 }
  0x17   : > { %s2737_s25 = scalar_select %p2384_p3, 1, 0 }
  0x18   : > { %p1851_p7 = scmp.ge.s32.totalorder %s2247_s20, 1  ;;  %p522_p8 = scmp.lt.s32.totalorder %s2247_s20, 5 }
  0x19   : > { %2738 = sst [smem:[#allocation15_spill]] %s2737_s25  ;;  %s2775_s24 = smov (%p41_p5, %s2773_s24), 0 }
  0x1a   : > { %2739 = sst [smem:[#allocation16_spill]] %s2775_s24  ;;  %p2394_p9 = por %p417_p6, %p416_p4 }
  0x1b   : > { %p523_p10 = pnand %p1851_p7, %p522_p8  ;;  %s397_s27 = ssub.s32 %s2243_s19, %s2775_s24 }
  0x1c   : > { %s2740_s26 = scalar_select %p2394_p9, 1, 0 }
  0x1d   : > { %s400_s28 = sadd.s32 1, %s2227_s15  ;;  %p398_p11 = scmp.eq.s32.totalorder %s397_s27, 0 }
  0x1e   : > { %2741 = sst [smem:[#allocation17_spill]] %s2740_s26  ;;  %526 = sbr.rel (%p523_p10) target bundleno = 3894 (0xf36), region = 76 }
  0x1f   : > { %s2402_s21 = scalar_select %p398_p11, %s2227_s15, %s400_s28  }
  0x20   : > { %s2710_s22 = sand.u32 (!%p523_p10), 1, %s2223_s30   ;;  %p608_p12 = scmp.lt.s32.totalorder (!%p523_p10), %s2235_s17, 1 }
  0x21   : > { %2742 = sst [smem:[#allocation18_spill]] %s2402_s21  ;;  %s2408_s23 = sshll.u32 (!%p523_p10), %s2710_s22, 3 }
  0x22   : > { %p612_p13 = scmp.lt.s32.totalorder (!%p523_p10), %s2231_s16, 1  ;;  %s2743_s0 = sld [smem:[#allocation19_spill]] (!%p523_p10) }
  0x23   : > { %s609_s18 = scalar_select %p608_p12, %s2235_s17, 1 }
  0x24   : > { %s2413_s26 = scalar_select %p612_p13, %s2231_s16, 1 }
  0x25   : > { %s1853_s27 = sshll.u32 %s609_s18, 3  ;;  %s2744_s3 = sld [smem:[#allocation20_spill]] }
  0x26   : > { %s1906_s25 = sshll.u32 %s2413_s26, 5  ;;  %s2745_s4 = sld [smem:[#allocation21_spill]] }
  0x27   : > { %s633_s29 = scalar_lea.vmem %s2698_s6, %s2413_s26  ;;  %s1908_s30 = sshll.u32 %s2413_s26, 4 }
  0x28   : > { %s611_s22 = scalar_lea.vmem %s2743_s0, %s1853_s27  ;;  %s2462_s19 = scalar_lea.vmem %s2702_s10, %s1906_s25 }
  0x29   : > { %s652_s14 = scalar_lea.vmem %s2703_s11, %s2413_s26  ;;  %s607_s20 = scalar_lea.vmem [#allocation3], %s2408_s23 }
  0x2a   : > { %s2746_s15 = sld [smem:[#allocation9_spill]] }
  0x2b   : > { %s2430_s13 = scalar_lea.vmem %s2744_s3, %s1906_s25  ;;  %s2453_s3 = scalar_lea.vmem %s2700_s8, %s1908_s30 }
  0x2c   : > { %s2435_s16 = scalar_lea.vmem %s2745_s4, %s1906_s25  ;;  %s644_s4 = scalar_lea.vmem %s2701_s9, %s2413_s26 }
  0x30   : > { %p1862_p0 = scmp.ne.s32.totalorder %s2746_s15, 0 }
  0x32   : > { %657 = sbr.rel (%p1862_p0) target bundleno = 57 (0x39), region = 80 }
  0x37   : > { %v658_v0 = vld [vmem:[%s611_s22] sm:$0xff]  ;;  %vm659_vm0 = vcmask 261120  }
  0x38   : > { %660 = vst.msk [vmem:[#allocation2] sm:$0xff] %vm659_vm0, %v658_v0 }
  0x39 PF: > { %vm664_vm1 = vcmask 261120   ;;  %v2115_v8 = vld [vmem:[%s2430_s13 + $0x14] ss:$8 sps:$4 sm:$0xff]   ;;  %v2117_v9 = vld [vmem:[%s2430_s13 + $0x10] ss:$8 sps:$4 sm:$0xff]   ;;  %v2249_v11 = vmov 0   ;;  %s2747_s25 = scalar_lea.vmem %s2693_s1, %s2413_s26  ;;  %s2748_s17 = scalar_lea.vmem %s2694_s2, %s2413_s26 }
  0x3a   : > { %v2118_v10 = vld [vmem:[%s2430_s13 + $0x4] ss:$8 sps:$4 sm:$0xff]   ;;  %733 = vmatprep.subr.bf16.mxu1 %v2115_v8  ;;  %753 = vmatprep.mubr.bf16.mxu1 %v2249_v11  ;;  %v2120_v12 = vld [vmem:[%s2430_s13] ss:$8 sps:$4 sm:$0xff]   ;;  %v2250_v23 = vmov 0.0   ;;  %vm2251_vm2 = vmmov 0   ;;  %s2749_s15 = scalar_lea.vmem %s2697_s5, %s2413_s26 }
  0x3b   : > { %734 = vmatpush1.bf16.msra.mxu1 %v2117_v9  ;;  %v1863_v17 = vld [vmem:[%s2747_s25] ss:$0 sm:$0xff]  ;;  %1948 = vmatprep.subr.bf16.mxu0 %v2250_v23  ;;  %vm840_vm3 = vcmask 1043456   ;;  %s2252_s13 = smov 64   ;;  %s2253_s12 = smov 112   ;;  %vm776_vm4 = vcmask 130048  }
  0x3c   : > { %735 = vmatprep.subr.bf16.mxu1 %v2118_v10  ;;  %v1864_v19 = vld [vmem:[%s2748_s17] ss:$0 sm:$0xff]  ;;  %1950 = vmatprep.mubr.msk.bf16.mxu0 %vm2251_vm2, %v2250_v23  ;;  %s2254_s18 = smov 48   ;;  %vm823_vm5 = vcmask 64512   ;;  %s2255_s24 = smov 32   ;;  %vm1572_vm6 = vcmask 523264  }
  0x3d   : > { %s2256_s27 = smov 96   ;;  %s2257_s21 = smov 80  }
  0x3e   : > { %s2258_s28 = smov 16  }
  0x3f   : > { %v2470_v1 = vld [vmem:[#allocation2] sm:$0xff]  ;;  %736 = vmatpush1.bf16.msra.mxu1 %v2120_v12 }
  0x40   : > { %v665_v2 = vsel %vm664_vm1, %v2470_v1, 0.0  ;;  %1942 = vmatprep.subr.bf16.mxu1 %v2250_v23 }
  0x41   : > { %666 = vadd.xlane.f32.xlu0 %v665_v2 }
  0xca   : > { %v667_v3 = vpop.xlane.xlu0 %666 }
  0xcb   : > { %v669_v4 = vmul.f32 0.03125, %v667_v3 }
  0xcd   : > { %v670_v5 = vsub.f32 %v2470_v1, %v669_v4 }
  0xcf   : > { %v671_v6 = vmul.f32 %v670_v5, %v670_v5 }
  0xd1   : > { %v672_v7 = vsel %vm664_vm1, %v671_v6, 0.0  ;;  %v2122_v6 = vld [vmem:[%s2435_s16 + $0x8] sm:$0xff]  }
  0xd2   : > { %673 = vadd.xlane.f32.xlu0 %v672_v7 }
 0x15b   : > { %v674_v13 = vpop.xlane.xlu0 %673 }
 0x15c   : > { %v675_v14 = vmul.f32 0.03125, %v674_v13 }
 0x15e   : > { %v676_v15 = vadd.f32 1e-05, %v675_v14 }
 0x160   : > { %2131 = vrsqrt.f32 %v676_v15 }
 0x16d   : > { %v2132_v16 = vpop.eup %2131 }
 0x16e   : > { %v678_v18 = vmul.f32 %v2132_v16, %v670_v5  ;;  %v2121_v5 = vld [vmem:[%s2435_s16] sm:$0xff]  }
 0x170   : > { %v685_v20 = vmul.f32 %v1863_v17, %v678_v18 }
 0x172   : > { %v692_v21 = vadd.f32 %v1864_v19, %v685_v20 }
 0x174   : > { %v693_v22 = vpack.c.bf16 %v692_v21, %v692_v21 }
 0x176   : > { %1869 = vmatmul.mubr.msk.bf16.vlgmr.msra.gmra.mxu1 %vm664_vm1, %v693_v22 }
 0x177   : > { %1944 = vmatprep.mubr.msk.bf16.mxu1 %vm2251_vm2, %v2250_v23 }
 0x236   : > { %v755_v24 = vpop.f32.mrf.mxu1 }
 0x237   : > { %v770_v25 = vmul.f32 0.25, %v755_v24  ;;  %v2497_v26 = vpack.c.bf16 %v755_v24, %v755_v24 }
 0x238   : > { %v757_v27 = vpop.f32.mrf.mxu1 }
 0x239   : > { %v2499_v28 = vpack.c.bf16 %v770_v25, %v770_v25  ;;  %v2501_v29 = vpack.c.bf16 %v757_v27, %v757_v27  ;;  %774 = vrot.lane.b32.xlu1 %v2497_v26, %s2252_s13 }
 0x23a   : > { %v759_v30 = vpop.f32.mrf.mxu1 }
 0x23b   : > { %886 = vrot.lane.b32.xlu0 %v2499_v28, %s2253_s12  ;;  %v842_v31 = vsel %vm840_vm3, %v2501_v29, 0 }
 0x23c   : > { %v760_v32 = vpop.f32.mrf.mxu1  ;;  %1949 = vmatpush3.bf16.msra.mxu0 %v842_v31 }
 0x23d   : > { %888 = vrot.lane.b32.xlu1 %v2497_v26, %s2254_s18  ;;  %1960 = vmatprep.subr.bf16.mxu0 %v2250_v23 }
 0x2ab   : > { %v775_v33 = vpop.permute.xlu1 %774 }
 0x2ac   : > { %v781_v34 = vsel %vm776_vm4, %v775_v33, 0 }
 0x2ad   : > { %1943 = vmatpush3.bf16.xpose.msra.mxu1 %v781_v34  ;;  %v887_v37 = vpop.permute.xlu0 %886 }
 0x2ae   : > { %1954 = vmatprep.subr.bf16.mxu1 %v2250_v23 }
 0x2af   : > { %v889_v35 = vpop.permute.xlu1 %888 }
 0x2b0   : > { %v894_v36 = vsel %vm776_vm4, %v889_v35, 0 }
 0x2b4   : > { %1945 = vmatmul.mubr.msk.bf16.vlgmr.msra.gmra.mxu1 %vm776_vm4, %v2499_v28 }
 0x2b5   : > { %1955 = vmatpush3.bf16.xpose.msra.mxu1 %v894_v36  ;;  %1956 = vmatprep.mubr.msk.bf16.mxu1 %vm2251_vm2, %v2250_v23 }
 0x2b6   : > { %1966 = vmatprep.subr.bf16.mxu1 %v2250_v23 }
 0x2bc   : > { %1957 = vmatmul.mubr.msk.bf16.vlgmr.msra.gmra.mxu1 %vm776_vm4, %v887_v37 }
 0x2bd   : > { %1968 = vmatprep.mubr.msk.bf16.mxu1 %vm2251_vm2, %v2250_v23  ;;  %1967 = vmatpush3.bf16.msra.mxu1 %v2122_v6  ;;  %v2124_v6 = vld [vmem:[%s2435_s16 + $0x18] sm:$0xff]  }
 0x2be   : > { %1978 = vmatprep.subr.bf16.mxu1 %v2250_v23 }
 0x374   : > { %v817_v38 = vpop.f32.mrf.mxu1 }
 0x375   : > { %v824_v39 = vsel %vm823_vm5, %v817_v38, -inf }
 0x376   : > { %825 = vmax.xlane.f32.xlu1 %v824_v39  ;;  %v1946_v40 = vpop.f32.mrf.mxu1 }
 0x378   : > { %v820_v41 = vpop.f32.mrf.mxu1 }
 0x37a   : > { %v1947_v42 = vpop.f32.mrf.mxu1 }
 0x37c   : > { %v930_v43 = vpop.f32.mrf.mxu1 }
 0x37d   : > { %v936_v44 = vsel %vm823_vm5, %v930_v43, -inf }
 0x37e   : > { %937 = vmax.xlane.f32.xlu0 %v936_v44  ;;  %v1958_v45 = vpop.f32.mrf.mxu1 }
 0x380   : > { %v933_v46 = vpop.f32.mrf.mxu1 }
 0x382   : > { %v1959_v47 = vpop.f32.mrf.mxu1 }
 0x394   : > { %1098 = vrot.lane.b32.xlu0 %v2497_v26, %s2255_s24 }
 0x3ff   : > { %v826_v48 = vpop.xlane.xlu1 %825 }
 0x400   : > { %v827_v49 = vsub.f32 %v817_v38, %v826_v48 }
 0x402   : > { %v828_v50 = vmul.f32 1.442695, %v827_v49 }
 0x404   : > { %2133 = vpow2.f32 %v828_v50 }
 0x407   : > { %v938_v51 = vpop.xlane.xlu0 %937 }
 0x408   : > { %v939_v52 = vsub.f32 %v930_v43, %v938_v51 }
 0x40a   : > { %v940_v53 = vmul.f32 1.442695, %v939_v52 }
 0x40b   : > { %v1099_v12 = vpop.permute.xlu0 %1098 }
 0x40c   : > { %2135 = vpow2.f32 %v940_v53  ;;  %v1104_v16 = vsel %vm776_vm4, %v1099_v12, 0 }
 0x411   : > { %v2134_v54 = vpop.eup %2133 }
 0x412   : > { %v830_v55 = vsel %vm823_vm5, %v2134_v54, 0.0 }
 0x413   : > { %831 = vadd.xlane.f32.xlu1 %v830_v55 }
 0x419   : > { %v2136_v56 = vpop.eup %2135 }
 0x41a   : > { %v942_v57 = vsel %vm823_vm5, %v2136_v56, 0.0 }
 0x41b   : > { %943 = vadd.xlane.f32.xlu1 %v942_v57 }
 0x42c   : > { %949 = vrot.lane.b32.xlu1 %v2501_v29, %s2253_s12  ;;  %s2751_s12 = sld [smem:[#allocation9_spill]] }
 0x430   : > { %1096 = vrot.lane.b32.xlu1 %v2499_v28, %s2256_s27 }
 0x432   : > { %p1899_p1 = scmp.ne.s32.totalorder %s2751_s12, 1 }
 0x433   : > { %s2752_s18 = sld [smem:[#allocation22_spill]] (!%p1899_p1) }
 0x49c   : > { %v832_v58 = vpop.xlane.xlu1 %831 }
 0x49d   : > { %2137 = vrcp.f32 %v832_v58 }
 0x4a4   : > { %v944_v59 = vpop.xlane.xlu1 %943 }
 0x4a5   : > { %2139 = vrcp.f32 %v944_v59 }
 0x4a8   : > { %v950_v62 = vpop.permute.xlu1 %949 }
 0x4a9   : > { %v955_v0 = vsel %vm840_vm3, %v950_v62, 0 }
 0x4aa   : > { %v2138_v60 = vpop.eup %2137 }
 0x4ab   : > { %v834_v61 = vmul.f32 %v2138_v60, %v2134_v54 }
 0x4ac   : > { %v1097_v19 = vpop.permute.xlu1 %1096 }
 0x4ad   : > { %v835_v63 = vpack.c.bf16 %v834_v61, %v834_v61 }
 0x4af   : > { %1951 = vmatmul.mubr.msk.bf16.vlgmr.msra.gmra.mxu0 %vm823_vm5, %v835_v63 }
 0x4b0   : > { %1961 = vmatpush3.bf16.msra.mxu0 %v955_v0  ;;  %1962 = vmatprep.mubr.msk.bf16.mxu0 %vm2251_vm2, %v2250_v23 }
 0x4b1   : > { %1972 = vmatprep.subr.bf16.mxu0 %v2250_v23 }
 0x4b2   : > { %v2140_v2 = vpop.eup %2139 }
 0x4b3   : > { %v946_v3 = vmul.f32 %v2140_v2, %v2136_v56 }
 0x4b5   : > { %v947_v4 = vpack.c.bf16 %v946_v3, %v946_v3 }
 0x4b7   : > { %1963 = vmatmul.mubr.msk.bf16.vlgmr.msra.gmra.mxu0 %vm823_vm5, %v947_v4 }
 0x4b8   : > { %1974 = vmatprep.mubr.msk.bf16.mxu0 %vm2251_vm2, %v2250_v23  ;;  %1973 = vmatpush3.bf16.msra.mxu0 %v2121_v5 }
 0x4b9   : > { %1984 = vmatprep.subr.bf16.mxu0 %v2250_v23 }
 0x56f   : > { %v878_v7 = vpop.f32.mrf.mxu0 }
 0x570   : > { %v884_v8 = vpack.c.bf16 %v878_v7, %v878_v7 }
 0x571   : > { %v1952_v9 = vpop.f32.mrf.mxu0 }
 0x572   : > { %1975 = vmatmul.mubr.msk.bf16.vlgmr.msra.gmra.mxu0 %vm776_vm4, %v884_v8 }
 0x573   : > { %v881_v10 = vpop.f32.mrf.mxu0  ;;  %1986 = vmatprep.mubr.msk.bf16.mxu0 %vm2251_vm2, %v2250_v23 }
 0x575   : > { %v1953_v11 = vpop.f32.mrf.mxu0 }
 0x577   : > { %v991_v13 = vpop.f32.mrf.mxu0 }
 0x578   : > { %v997_v14 = vpack.c.bf16 %v991_v13, %v991_v13 }
 0x579   : > { %v1964_v15 = vpop.f32.mrf.mxu0 }
 0x57a   : > { %1969 = vmatmul.mubr.msk.bf16.vlgmr.msra.gmra.mxu1 %vm776_vm4, %v997_v14 }
 0x57b   : > { %1979 = vmatpush3.bf16.xpose.msra.mxu1 %v1104_v16  ;;  %v994_v17 = vpop.f32.mrf.mxu0  ;;  %1980 = vmatprep.mubr.msk.bf16.mxu1 %vm2251_vm2, %v2250_v23 }
 0x57c   : > { %1990 = vmatprep.subr.bf16.mxu1 %v2250_v23 }
 0x57d   : > { %v1965_v18 = vpop.f32.mrf.mxu0 }
 0x582   : > { %1981 = vmatmul.mubr.msk.bf16.vlgmr.msra.gmra.mxu1 %vm776_vm4, %v1097_v19 }
 0x583   : > { %1992 = vmatprep.mubr.msk.bf16.mxu1 %vm2251_vm2, %v2250_v23 }
 0x632   : > { %v1090_v20 = vpop.f32.mrf.mxu0 }
 0x634   : > { %v1976_v21 = vpop.f32.mrf.mxu0 }
 0x636   : > { %v1093_v22 = vpop.f32.mrf.mxu0 }
 0x638   : > { %v1977_v24 = vpop.f32.mrf.mxu0 }
 0x63a   : > { %v1041_v25 = vpop.f32.mrf.mxu1 }
 0x63b   : > { %v2553_v27 = vadd.f32 %v1090_v20, %v1041_v25  ;;  %v1886_v20 = vld [vmem:[%s2749_s15] ss:$0 sm:$0xff] }
 0x63c   : > { %v1970_v30 = vpop.f32.mrf.mxu1 }
 0x63e   : > { %v1044_v31 = vpop.f32.mrf.mxu1 }
 0x640   : > { %v1971_v32 = vpop.f32.mrf.mxu1 }
 0x642   : > { %v1140_v33 = vpop.f32.mrf.mxu1 }
 0x643   : > { %v1146_v34 = vsel %vm823_vm5, %v1140_v33, -inf }
 0x644   : > { %1147 = vmax.xlane.f32.xlu1 %v1146_v34  ;;  %v1982_v35 = vpop.f32.mrf.mxu1 }
 0x646   : > { %v1143_v36 = vpop.f32.mrf.mxu1 }
 0x648   : > { %v1983_v37 = vpop.f32.mrf.mxu1 }
 0x649   : > { %v2125_v37 = vld [vmem:[%s2453_s3 + $0x8] sm:$0xff]  }
 0x655   : > { %1158 = vrot.lane.b32.xlu1 %v2501_v29, %s2256_s27 }
 0x659   : > { %1257 = vrot.lane.b32.xlu1 %v2499_v28, %s2257_s21 }
 0x6cd   : > { %v1148_v38 = vpop.xlane.xlu1 %1147 }
 0x6ce   : > { %v1149_v39 = vsub.f32 %v1140_v33, %v1148_v38  ;;  %v2126_v38 = vld [vmem:[%s2453_s3] sm:$0xff]   ;;  %s2750_s3 = scalar_lea.vmem %s2699_s7, %s2413_s26 }
 0x6d0   : > { %v1150_v40 = vmul.f32 1.442695, %v1149_v39 }
 0x6d1   : > { %v1159_v41 = vpop.permute.xlu1 %1158 }
 0x6d2   : > { %2141 = vpow2.f32 %v1150_v40  ;;  %v1164_v42 = vsel %vm840_vm3, %v1159_v41, 0 }
 0x6d3   : > { %1985 = vmatpush3.bf16.msra.mxu0 %v1164_v42  ;;  %v1887_v42 = vld [vmem:[%s633_s29] ss:$0 sm:$0xff] }
 0x6d4   : > { %1996 = vmatprep.subr.bf16.mxu0 %v2250_v23 }
 0x6d5   : > { %v1258_v50 = vpop.permute.xlu1 %1257 }
 0x6df   : > { %v2142_v43 = vpop.eup %2141 }
 0x6e0   : > { %v1152_v44 = vsel %vm823_vm5, %v2142_v43, 0.0 }
 0x6e1   : > { %1153 = vadd.xlane.f32.xlu0 %v1152_v44  ;;  %v1888_v44 = vld [vmem:[%s2750_s3] ss:$0 sm:$0xff] }
 0x6f7   : > { %1259 = vrot.lane.b32.xlu0 %v2497_v26, %s2258_s28  ;;  %v2123_v26 = vld [vmem:[%s2435_s16 + $0x10] sm:$0xff]  }
 0x6f8   : > { %1991 = vmatpush3.bf16.msra.mxu1 %v2123_v26  ;;  %v1889_v26 = vld [vmem:[%s644_s4] ss:$0 sm:$0xff] }
 0x6f9   : > { %2002 = vmatprep.subr.bf16.mxu1 %v2250_v23 }
 0x76a   : > { %v1154_v45 = vpop.xlane.xlu0 %1153 }
 0x76b   : > { %2143 = vrcp.f32 %v1154_v45 }
 0x76e   : > { %v1260_v47 = vpop.permute.xlu0 %1259 }
 0x76f   : > { %v1265_v49 = vsel %vm776_vm4, %v1260_v47, 0  ;;  %v2127_v47 = vld [vmem:[%s2462_s19 + $0x18] sm:$0xff]  }
 0x778   : > { %v2144_v28 = vpop.eup %2143 }
 0x779   : > { %v1156_v46 = vmul.f32 %v2144_v28, %v2142_v43 }
 0x77b   : > { %v1157_v48 = vpack.c.bf16 %v1156_v46, %v1156_v46 }
 0x77d   : > { %1987 = vmatmul.mubr.msk.bf16.vlgmr.msra.gmra.mxu0 %vm823_vm5, %v1157_v48  ;;  %v2128_v48 = vld [vmem:[%s2462_s19 + $0x10] sm:$0xff]  }
 0x77e   : > { %1997 = vmatpush3.bf16.xpose.msra.mxu0 %v1265_v49  ;;  %1998 = vmatprep.mubr.msk.bf16.mxu0 %vm2251_vm2, %v2250_v23  ;;  %v2129_v49 = vld [vmem:[%s2462_s19 + $0x8] sm:$0xff]  }
 0x77f   : > { %2008 = vmatprep.subr.bf16.mxu0 %v2250_v23 }
 0x785   : > { %1999 = vmatmul.mubr.msk.bf16.vlgmr.msra.gmra.mxu0 %vm776_vm4, %v1258_v50  ;;  %v2130_v50 = vld [vmem:[%s2462_s19] sm:$0xff]  }
 0x786   : > { %2010 = vmatprep.mubr.msk.bf16.mxu0 %vm2251_vm2, %v2250_v23  ;;  %2009 = vmatpush3.bf16.msra.mxu0 %v2124_v6 }
 0x787   : > { %2022 = vmatprep.subr.bf16.mxu0 %v2250_v23 }
 0x83d   : > { %v1200_v51 = vpop.f32.mrf.mxu0 }
 0x83e   : > { %v1206_v52 = vpack.c.bf16 %v1200_v51, %v1200_v51 }
 0x83f   : > { %v1988_v53 = vpop.f32.mrf.mxu0 }
 0x840   : > { %1993 = vmatmul.mubr.msk.bf16.vlgmr.msra.gmra.mxu1 %vm776_vm4, %v1206_v52 }
 0x841   : > { %v1203_v54 = vpop.f32.mrf.mxu0  ;;  %2004 = vmatprep.mubr.msk.bf16.mxu1 %vm2251_vm2, %v2250_v23 }
 0x843   : > { %v1989_v55 = vpop.f32.mrf.mxu0 }
 0x845   : > { %v1301_v56 = vpop.f32.mrf.mxu0 }
 0x846   : > { %v1307_v57 = vsel %vm823_vm5, %v1301_v56, -inf }
 0x847   : > { %1308 = vmax.xlane.f32.xlu1 %v1307_v57  ;;  %v2000_v58 = vpop.f32.mrf.mxu0 }
 0x849   : > { %v1304_v59 = vpop.f32.mrf.mxu0 }
 0x84b   : > { %v2001_v60 = vpop.f32.mrf.mxu0 }
 0x858   : > { %1319 = vrot.lane.b32.xlu1 %v2501_v29, %s2257_s21  ;;  %s2753_s21 = sld [smem:[#allocation23_spill]] (!%p1899_p1) }
 0x8d0   : > { %v1309_v61 = vpop.xlane.xlu1 %1308 }
 0x8d1   : > { %v1310_v62 = vsub.f32 %v1301_v56, %v1309_v61 }
 0x8d3   : > { %v1311_v63 = vmul.f32 1.442695, %v1310_v62 }
 0x8d4   : > { %v1320_v0 = vpop.permute.xlu1 %1319 }
 0x8d5   : > { %2145 = vpow2.f32 %v1311_v63  ;;  %v1325_v2 = vsel %vm840_vm3, %v1320_v0, 0 }
 0x8d6   : > { %2003 = vmatpush3.bf16.msra.mxu1 %v1325_v2  ;;  %v1893_v2 = vld [vmem:[%s652_s14] ss:$0 sm:$0xff] }
 0x8d7   : > { %2014 = vmatprep.subr.bf16.mxu1 %v2250_v23 }
 0x8e2   : > { %v2146_v3 = vpop.eup %2145 }
 0x8e3   : > { %v1313_v4 = vsel %vm823_vm5, %v2146_v3, 0.0 }
 0x8e4   : > { %1314 = vadd.xlane.f32.xlu0 %v1313_v4 }
 0x900   : > { %v1250_v5 = vpop.f32.mrf.mxu1 }
 0x901   : > { %v1256_v7 = vadd.f32 %v1250_v5, %v2553_v27 }
 0x902   : > { %v1994_v8 = vpop.f32.mrf.mxu1 }
 0x904   : > { %v1253_v29 = vpop.f32.mrf.mxu1 }
 0x906   : > { %v1995_v9 = vpop.f32.mrf.mxu1 }
 0x96d   : > { %v1315_v10 = vpop.xlane.xlu0 %1314 }
 0x96e   : > { %2147 = vrcp.f32 %v1315_v10 }
 0x97b   : > { %v2148_v11 = vpop.eup %2147 }
 0x97c   : > { %v1317_v12 = vmul.f32 %v2148_v11, %v2146_v3 }
 0x97e   : > { %v1318_v13 = vpack.c.bf16 %v1317_v12, %v1317_v12 }
 0x980   : > { %2005 = vmatmul.mubr.msk.bf16.vlgmr.msra.gmra.mxu1 %vm823_vm5, %v1318_v13 }
 0x981   : > { %2018 = vmatprep.mubr.msk.bf16.mxu1 %vm2251_vm2, %v2250_v23  ;;  %2015 = vmatpush3.bf16.msra.mxu1 %v2125_v37 }
 0x982   : > { %2016 = vmatprep.subr.bf16.mxu1 %v2250_v23 }
 0x985   : > { %2017 = vmatpush3.bf16.msra.mxu1 %v2126_v38 }
 0xa40   : > { %v1361_v14 = vpop.f32.mrf.mxu1 }
 0xa41   : > { %v1367_v15 = vpack.c.bf16 %v1361_v14, %v1361_v14 }
 0xa42   : > { %v2006_v16 = vpop.f32.mrf.mxu1 }
 0xa43   : > { %2011 = vmatmul.mubr.msk.bf16.vlgmr.msra.gmra.mxu0 %vm776_vm4, %v1367_v15 }
 0xa44   : > { %v1364_v17 = vpop.f32.mrf.mxu1  ;;  %2030 = vmatprep.mubr.msk.bf16.mxu0 %vm2251_vm2, %v2250_v23  ;;  %2023 = vmatpush3.bf16.msra.mxu0 %v2127_v47 }
 0xa45   : > { %2024 = vmatprep.subr.bf16.mxu0 %v2250_v23 }
 0xa46   : > { %v2007_v18 = vpop.f32.mrf.mxu1 }
 0xa48   : > { %2025 = vmatpush3.bf16.msra.mxu0 %v2128_v48 }
 0xa49   : > { %2026 = vmatprep.subr.bf16.mxu0 %v2250_v23 }
 0xa4c   : > { %2027 = vmatpush3.bf16.msra.mxu0 %v2129_v49 }
 0xa4d   : > { %2028 = vmatprep.subr.bf16.mxu0 %v2250_v23 }
 0xa50   : > { %2029 = vmatpush3.bf16.msra.mxu0 %v2130_v50 }
 0xb03   : > { %v1411_v19 = vpop.f32.mrf.mxu0 }
 0xb04   : > { %v1417_v21 = vadd.f32 %v1411_v19, %v1256_v7 }
 0xb05   : > { %v2012_v22 = vpop.f32.mrf.mxu0 }
 0xb06   : > { %v1425_v24 = vadd.f32 %v1886_v20, %v1417_v21 }
 0xb07   : > { %v1414_v25 = vpop.f32.mrf.mxu0 }
 0xb08   : > { %v1426_v27 = vadd.f32 %v1425_v24, %v2470_v1 }
 0xb09   : > { %v2013_v30 = vpop.f32.mrf.mxu0 }
 0xb0a   : > { %v1429_v31 = vsel %vm664_vm1, %v1426_v27, 0.0 }
 0xb0b   : > { %1430 = vadd.xlane.f32.xlu0 %v1429_v31 }
 0xb94   : > { %v1431_v32 = vpop.xlane.xlu0 %1430 }
 0xb95   : > { %v1432_v33 = vmul.f32 0.03125, %v1431_v32 }
 0xb97   : > { %v1433_v34 = vsub.f32 %v1426_v27, %v1432_v33 }
 0xb99   : > { %v1434_v35 = vmul.f32 %v1433_v34, %v1433_v34 }
 0xb9b   : > { %v1435_v36 = vsel %vm664_vm1, %v1434_v35, 0.0 }
 0xb9c   : > { %1436 = vadd.xlane.f32.xlu0 %v1435_v36 }
 0xc25   : > { %v1437_v1 = vpop.xlane.xlu0 %1436 }
 0xc26   : > { %v1438_v39 = vmul.f32 0.03125, %v1437_v1 }
 0xc28   : > { %v1439_v40 = vadd.f32 1e-05, %v1438_v39 }
 0xc2a   : > { %2149 = vrsqrt.f32 %v1439_v40 }
 0xc37   : > { %v2150_v41 = vpop.eup %2149 }
 0xc38   : > { %v1441_v43 = vmul.f32 %v2150_v41, %v1433_v34 }
 0xc3a   : > { %v1448_v45 = vmul.f32 %v1887_v42, %v1441_v43 }
 0xc3c   : > { %v1455_v28 = vadd.f32 %v1888_v44, %v1448_v45 }
 0xc3e   : > { %v1456_v46 = vpack.c.bf16 %v1455_v28, %v1455_v28 }
 0xc40   : > { %2019 = vmatmul.mubr.msk.bf16.vlgmr.msra.gmra.mxu1 %vm664_vm1, %v1456_v46 }
 0xd00   : > { %v1517_v51 = vpop.f32.mrf.mxu1 }
 0xd01   : > { %v1518_v52 = vadd.f32 %v1889_v26, %v1517_v51 }
 0xd02   : > { %v2020_v53 = vpop.f32.mrf.mxu1 }
 0xd03   : > { %v1524_v54 = vmul.f32 0.044715, %v1518_v52  ;;  %v1523_v23 = vmul.f32 0.5, %v1518_v52 }
 0xd04   : > { %v1520_v55 = vpop.f32.mrf.mxu1 }
 0xd05   : > { %v1525_v56 = vmul.f32 %v1524_v54, %v1518_v52 }
 0xd06   : > { %v2021_v57 = vpop.f32.mrf.mxu1 }
 0xd07   : > { %v1526_v58 = vmul.f32 %v1525_v56, %v1518_v52 }
 0xd09   : > { %v1527_v59 = vadd.f32 %v1526_v58, %v1518_v52 }
 0xd0b   : > { %v1528_v60 = vmul.f32 0.7978846, %v1527_v59 }
 0xd0d   : > { %2151 = vtanh.f32 %v1528_v60 }
 0xd1a   : > { %v2152_v61 = vpop.eup %2151 }
 0xd1b   : > { %v1530_v62 = vadd.f32 1.0, %v2152_v61 }
 0xd1d   : > { %v1531_v63 = vmul.f32 %v1530_v62, %v1523_v23 }
 0xd1f   : > { %v1532_v0 = vpack.c.bf16 %v1531_v63, %v1531_v63 }
 0xd21   : > { %2031 = vmatmul.mubr.msk.bf16.vlgmr.msra.gmra.mxu0 %vm1572_vm6, %v1532_v0 }
 0xde1   : > { %v1610_v3 = vpop.f32.mrf.mxu0 }
 0xde2   : > { %v1611_v4 = vadd.f32 %v1893_v2, %v1610_v3 }
 0xde3   : > { %v2032_v5 = vpop.f32.mrf.mxu0  ;;  %1621 = sbr.rel (%p1899_p1) target bundleno = 3869 (0xf1d), region = 84 }
 0xde4   : > { %v1616_v6 = vadd.f32 %v1611_v4, %v1426_v27 }
 0xde5   : > { %v1613_v7 = vpop.f32.mrf.mxu0 }
 0xde6   : > { %1617 = vst.msk [vmem:[#allocation2] sm:$0xff] %vm664_vm1, %v1616_v6 }
 0xde7   : > { %v2033_v8 = vpop.f32.mrf.mxu0 }
 0xde8   : > { %v1624_v29 = vsel %vm664_vm1, %v1616_v6, 0.0  ;;  %v1900_v18 = vld [vmem:[%s2752_s18] ss:$0 sm:$0xff] }
 0xde9   : > { %1625 = vadd.xlane.f32.xlu0 %v1624_v29  ;;  %v1901_v20 = vld [vmem:[%s2753_s21] ss:$0 sm:$0xff] }
 0xe72   : > { %v1626_v9 = vpop.xlane.xlu0 %1625 }
 0xe73   : > { %v1627_v10 = vmul.f32 0.03125, %v1626_v9 }
 0xe75   : > { %v1628_v11 = vsub.f32 %v1616_v6, %v1627_v10 }
 0xe77   : > { %v1629_v12 = vmul.f32 %v1628_v11, %v1628_v11 }
 0xe79   : > { %v1630_v13 = vsel %vm664_vm1, %v1629_v12, 0.0 }
 0xe7a   : > { %1631 = vadd.xlane.f32.xlu0 %v1630_v13 }
 0xf03   : > { %v1632_v14 = vpop.xlane.xlu0 %1631 }
 0xf04   : > { %v1633_v15 = vmul.f32 0.03125, %v1632_v14 }
 0xf06   : > { %v1634_v16 = vadd.f32 1e-05, %v1633_v15 }
 0xf08   : > { %2153 = vrsqrt.f32 %v1634_v16 }
 0xf15   : > { %v2154_v17 = vpop.eup %2153 }
 0xf16   : > { %v1636_v19 = vmul.f32 %v2154_v17, %v1628_v11 }
 0xf18   : > { %v1643_v21 = vmul.f32 %v1900_v18, %v1636_v19 }
 0xf1a   : > { %v1650_v22 = vadd.f32 %v1901_v20, %v1643_v21 }
 0xf1c   : > { %1651 = vst.msk [vmem:[%s607_s20] sm:$0xff] %vm664_vm1, %v1650_v22 }
 0xf1d PF: > { %s2754_s28 = sld [smem:[#allocation10_spill]]  ;;  %s1666_s29 = sshll.u32 %s607_s20, 4  ;;  %s1667_s29 = int_to_ptr.vmem [resolvable:$true] %s1666_s29 }
 0xf1e   : > { %s2755_s16 = sld [smem:[#allocation7_spill]]  ;;  %s2155_s19 = scalar_lea.vmem %s1667_s29, 128 }
 0xf1f   : > { %s2757_s30 = sld [smem:[#allocation24_spill]]  ;;  %p2156_p2 = scmp.ne.s32.totalorder %s1667_s29, %s2155_s19 }
 0xf20   : > { %s2259_s12 = smov [#allocation3]  }
 0xf21   : > { %p2157_p4 = pnand %p2156_p2, %p2384_p3  ;;  %s2159_s26 = sshll.u32 %s2259_s12, 4  ;;  %s2160_s26 = int_to_ptr.vmem [resolvable:$false] %s2159_s26 }
 0xf22   : > { %s2161_s14 = scalar_lea.vmem %s2160_s26, 256  ;;  %p2162_p6 = scmp.lt.s32.totalorder %s1667_s29, %s2160_s26 }
 0xf23   : > { %s1903_s15 = sshll.u32 %s2754_s28, 7  ;;  %p2158_p5 = pneg %p2157_p4 }
 0xf24   : > { %s2759_s13 = sand.u32 1, %s2755_s16   ;;  %p2163_p7 = scmp.lt.s32.totalorder %s2161_s14, %s2155_s19 }
 0xf25   : > { %s2758_s3 = smov %s2757_s30  ;;  %s1664_s17 = scalar_lea.hbm %s2757_s30, %s1903_s15 }
 0xf26   : > { %s1653_s4 = scalar_lea.sflag [#allocation4], %s2759_s13  ;;  %p2164_p8 = por %p2163_p7, %p2162_p6 }
 0xf28   : > { %p2165_p10 = pnand %p2164_p8, %p2158_p5 }
 0xf2a   : > { %2168 = shalt.err (!%p2165_p10)
}
 0xf2b   : > { %s2169_s18 = scalar_lea.hbm %s1664_s17, 128  ;;  %s2173_s24 = scalar_lea.hbm %s2758_s3, 256 }
 0xf2c   : > { %p2170_p11 = scmp.ne.s32.totalorder %s1664_s17, %s2169_s18  ;;  %p2174_p0 = scmp.lt.s32.totalorder %s1664_s17, %s2758_s3 }
 0xf2d   : > { %p2175_p1 = scmp.lt.s32.totalorder %s2173_s24, %s2169_s18 }
 0xf2e   : > { %p2171_p12 = pnand %p2170_p11, %p2384_p3 }
 0xf2f   : > { %p2176_p2 = por %p2175_p1, %p2174_p0 }
 0xf30   : > { %p2172_p13 = pneg %p2171_p12 }
 0xf32   : > { %p2177_p4 = pnand %p2176_p2, %p2172_p13 }
 0xf34   : > { %2180 = shalt.err (!%p2177_p4)
}
 0xf35   : > { %2034 = dma.vmem_to_hbm [thread:$0]  (%p2384_p3), %s1667_s29, 128, %s1664_s17, %s1653_s4  }
 0xf36 PF: > { %s2760_s28 = sld [smem:[#allocation13_spill]] }
 0xf37   : > { %s2761_s16 = sld [smem:[#allocation6_spill]] }
 0xf3c   : > { %p2040_p5 = scmp.ge.s32.totalorder %s2760_s28, 2 }
 0xf3d   : > { %s1678_s25 = sand.u32 1, %s2761_s16  }
 0xf3e   : > { %p2037_p6 = pnand %p2040_p5, %p2394_p9  ;;  %s1679_s22 = scalar_lea.sflag [#allocation4], %s1678_s25 }
 0xf40   : > { %p2038_p7 = pneg %p2037_p6 }
 0xf42   : > { %2214 = dma.done.wait (%p2038_p7), %s1679_s22, 128  }
 0xf43   : > { %2216 = vsyncadd (%p2038_p7), %s1679_s22, 4294967168  ;;  %s27_s20 = sadd.s32 1, %s2760_s28   ;;  %s2763_s29 = sld [smem:[#allocation7_spill]] }
 0xf44   : > { %p24_p8 = scmp.ge.s32.totalorder %s27_s20, 6   ;;  %s2764_s30 = sld [smem:[#allocation8_spill]] }
 0xf45   : > { %s2765_s15 = sld [smem:[#allocation18_spill]] }
 0xf46   : > { %s2766_s16 = sld [smem:[#allocation11_spill]]  ;;  %26 = sbr.rel (!%p24_p8) target bundleno = 12 (0xc), region = 152 }
 0xf47   : > { %s2767_s17 = sld [smem:[#allocation12_spill]] }
 0xf48   : > { %s2768_s18 = sld [smem:[#allocation14_spill]] }
 0xf49   : > { %s2769_s19 = sld [smem:[#allocation16_spill]] }
 0xf4b   :  { %1684 = vsyncpa [#allocation4], 1 }
 0xf4c   :  { %1686 = vsyncpa [#allocation4 + $0x1], 1 }

</bundles_post_ra>
